<compile_context>
chip_gen: v7x
topology: tpu7x:2x2x1
jax: 0.10.0
libtpu: 0.0.40
codegen_flags: <defaults>
</compile_context>

<pallas_src>
import math
import jax
import jax.numpy as jnp
from jax.experimental import pallas as pl
from jax.experimental.pallas import tpu as pltpu


def make_gcn_kernel():
    def gcn_kernel(x_ref, adj_ref, wcat_ref, bcat_ref, mean_ref, out_ref):
        """One grid step handles one row-block of nodes, all layers fused.

        x_ref:    (N, F)      VMEM -- full node features (layer/row invariant)
        adj_ref:  (TN, N)     VMEM -- row slab of the adjacency matrix
        wcat_ref: (F, L*F)    VMEM -- all layer weights concatenated on lanes
        bcat_ref: (1, L*F)    VMEM -- all layer biases concatenated on lanes
        mean_ref: (L*F, F)    VMEM -- stacked (1/L)*I blocks (layer-mean matmul)
        out_ref:  (TN, F)     VMEM -- output row slab
        """
        # z = adj_rows @ x  -- layer-invariant, computed once per row block.
        z = jnp.dot(adj_ref[...], x_ref[...], preferred_element_type=jnp.float32)

        # One fused MXU call for all L layers: [TN, F] @ [F, L*F].
        h = jnp.dot(z, wcat_ref[...], preferred_element_type=jnp.float32)

        # Bias add (single broadcast) + LeakyReLU (negative_slope = 0.01,
        # the nn.LeakyReLU() default).
        h = h + bcat_ref[...]
        h = jnp.where(h >= 0.0, h, 0.01 * h)

        # TODO(synk): nn.Dropout(p=0.1) is identity in eval mode; training-mode
        # stochastic dropout is intentionally not applied here.

        # Layer mean via MXU: [TN, L*F] @ [L*F, F] with stacked (1/L)*I blocks.
        out_ref[...] = jnp.dot(
            h, mean_ref[...], preferred_element_type=jnp.float32
        ).astype(out_ref.dtype)

    return gcn_kernel


def gcn_forward(x, adj, weights, biases):
    """x: [N, F] f32, adj: [N, N] f32, weights: [L, F, F], biases: [L, F]."""
    N, F = x.shape
    L = weights.shape[0]

    # W_cat[f, l*F + g] = weights[l, f, g]  -> one [F, L*F] operand so all
    # layer matmuls collapse into a single MXU call inside the kernel.
    w_cat = jnp.transpose(weights, (1, 0, 2)).reshape(F, L * F)
    b_cat = biases.reshape(1, L * F)

    # Layer-mean matrix: L vertically stacked (1/L)*identity blocks, [L*F, F].
    mean_mat = jnp.tile(jnp.eye(F, dtype=jnp.float32), (L, 1)) * (1.0 / L)

    # Row-tile adj so the kernel survives larger N (x stays resident: N*F*4 B).
    # At N=8 this is a single grid step (zero pipelining overhead).
    TN = N if N <= 512 else 512
    grid = (pl.cdiv(N, TN),)

    # NOTE: output last dim is F=32 (< 128 lanes) -> masked stores; F is fixed
    # by the module's nhid, so this is left as-is (negligible at these sizes).
    return pl.pallas_call(
        make_gcn_kernel(),
        out_shape=jax.ShapeDtypeStruct((N, F), x.dtype),
        grid_spec=pltpu.PrefetchScalarGridSpec(
            num_scalar_prefetch=0,
            grid=grid,
            in_specs=[
                pl.BlockSpec((N, F), lambda i: (0, 0)),       # x (resident)
                pl.BlockSpec((TN, N), lambda i: (i, 0)),      # adj row slab
                pl.BlockSpec((F, L * F), lambda i: (0, 0)),   # W_cat
                pl.BlockSpec((1, L * F), lambda i: (0, 0)),   # b_cat
                pl.BlockSpec((L * F, F), lambda i: (0, 0)),   # layer-mean matrix
            ],
            out_specs=pl.BlockSpec((TN, F), lambda i: (i, 0)),
        ),
        compiler_params=pltpu.CompilerParams(
            dimension_semantics=("parallel",),  # row blocks are independent
        ),
    )(x, adj, w_cat, b_cat, mean_mat)


def gcn_reference(x, adj, weights, biases):
    """Pure-JAX reference for correctness check (original association order)."""
    outs = []
    for l in range(weights.shape[0]):
        h = adj @ (x @ weights[l]) + biases[l]
        outs.append(jnp.where(h >= 0.0, h, 0.01 * h))
    return jnp.mean(jnp.stack(outs, axis=0), axis=0)


if __name__ == "__main__":
    # Small, module-consistent sizes: 8 graph nodes, nhid=32, 5 GCN layers.
    N = 8
    NHID = 32
    LAYERS = 5

    key = jax.random.PRNGKey(0)
    k_x, k_adj, k_w, k_b = jax.random.split(key, 4)

    # Node features and a (dense, row-normalized) adjacency matrix.
    x = jax.random.normal(k_x, (N, NHID), dtype=jnp.float32)
    adj_raw = jax.random.uniform(k_adj, (N, N), dtype=jnp.float32)
    adj = adj_raw / jnp.sum(adj_raw, axis=-1, keepdims=True)

    # Deterministic init matching GraphConvolution.reset_parameters:
    # uniform(-stdv, stdv) with stdv = 1/sqrt(out_features).
    stdv = 1.0 / math.sqrt(NHID)
    weights = jax.random.uniform(
        k_w, (LAYERS, NHID, NHID), dtype=jnp.float32, minval=-stdv, maxval=stdv
    )
    biases = jax.random.uniform(
        k_b, (LAYERS, NHID), dtype=jnp.float32, minval=-stdv, maxval=stdv
    )

    out = gcn_forward(x, adj, weights, biases)
    out = jax.block_until_ready(out)

    ref = gcn_reference(x, adj, weights, biases)
    assert out.shape == (N, NHID)
    assert jnp.allclose(out, ref, atol=1e-5, rtol=1e-5), "mismatch vs JAX reference"

    print("KERNEL_OK")
</pallas_src>

<mosaic_0001>
module attributes {stable_mosaic.version = 11 : i64} {
  func.func @gcn_kernel(%arg0: i32, %arg1: memref<8x32xf32, #tpu.memory_space<vmem>>, %arg2: memref<8x8xf32, #tpu.memory_space<vmem>>, %arg3: memref<32x160xf32, #tpu.memory_space<vmem>>, %arg4: memref<1x160xf32, #tpu.memory_space<vmem>>, %arg5: memref<160x32xf32, #tpu.memory_space<vmem>>, %arg6: memref<8x32xf32, #tpu.memory_space<vmem>>) attributes {dimension_semantics = [#tpu.dimension_semantics<parallel>], iteration_bounds = array<i64: 1>, scalar_prefetch = 0 : i64, scratch_operands = 0 : i64, tpu.core_type = #tpu.core_type<tc>, window_params = [{pipeline_mode = #tpu.pipeline_mode<synchronous>, transform_indices = @transform_0, window_bounds = array<i64: 8, 32>}, {transform_indices = @transform_1, window_bounds = array<i64: 8, 8>}, {pipeline_mode = #tpu.pipeline_mode<synchronous>, transform_indices = @transform_2, window_bounds = array<i64: 32, 160>}, {pipeline_mode = #tpu.pipeline_mode<synchronous>, transform_indices = @transform_3, window_bounds = array<i64: 1, 160>}, {pipeline_mode = #tpu.pipeline_mode<synchronous>, transform_indices = @transform_4, window_bounds = array<i64: 160, 32>}, {transform_indices = @transform_5, window_bounds = array<i64: 8, 32>}]} {
    %c0 = arith.constant 0 : index
    %c0_0 = arith.constant 0 : index
    %0 = vector.load %arg2[%c0, %c0_0] : memref<8x8xf32, #tpu.memory_space<vmem>>, vector<8x8xf32>
    %c0_1 = arith.constant 0 : index
    %c0_2 = arith.constant 0 : index
    %1 = vector.load %arg1[%c0_1, %c0_2] : memref<8x32xf32, #tpu.memory_space<vmem>>, vector<8x32xf32>
    %cst = arith.constant dense<0.000000e+00> : vector<8x32xf32>
    %2 = tpu.matmul %0, %1, %cst {dimension_numbers = #tpu.dot_dimension_numbers<[1], [0], [0], [1], [0, 0, 1, 1], [], []>} : vector<8x8xf32>, vector<8x32xf32>, vector<8x32xf32> -> vector<8x32xf32>
    %c0_3 = arith.constant 0 : index
    %c0_4 = arith.constant 0 : index
    %3 = vector.load %arg3[%c0_3, %c0_4] : memref<32x160xf32, #tpu.memory_space<vmem>>, vector<32x160xf32>
    %cst_5 = arith.constant dense<0.000000e+00> : vector<8x160xf32>
    %4 = tpu.matmul %2, %3, %cst_5 {dimension_numbers = #tpu.dot_dimension_numbers<[1], [0], [0], [1], [0, 0, 1, 1], [], []>} : vector<8x32xf32>, vector<32x160xf32>, vector<8x160xf32> -> vector<8x160xf32>
    %c0_6 = arith.constant 0 : index
    %c0_7 = arith.constant 0 : index
    %5 = vector.load %arg4[%c0_6, %c0_7] : memref<1x160xf32, #tpu.memory_space<vmem>>, vector<1x160xf32>
    %6 = vector.broadcast %5 : vector<1x160xf32> to vector<8x160xf32>
    %7 = arith.addf %4, %6 : vector<8x160xf32>
    %cst_8 = arith.constant 0.000000e+00 : f32
    %8 = vector.broadcast %cst_8 : f32 to vector<8x160xf32>
    %9 = arith.cmpf oge, %7, %8 : vector<8x160xf32>
    %cst_9 = arith.constant 0.00999999977 : f32
    %10 = vector.broadcast %cst_9 : f32 to vector<8x160xf32>
    %11 = arith.mulf %10, %7 : vector<8x160xf32>
    %12 = arith.select %9, %7, %11 : vector<8x160xi1>, vector<8x160xf32>
    %c0_10 = arith.constant 0 : index
    %c0_11 = arith.constant 0 : index
    %13 = vector.load %arg5[%c0_10, %c0_11] : memref<160x32xf32, #tpu.memory_space<vmem>>, vector<160x32xf32>
    %cst_12 = arith.constant dense<0.000000e+00> : vector<8x32xf32>
    %14 = tpu.matmul %12, %13, %cst_12 {dimension_numbers = #tpu.dot_dimension_numbers<[1], [0], [0], [1], [0, 0, 1, 1], [], []>} : vector<8x160xf32>, vector<160x32xf32>, vector<8x32xf32> -> vector<8x32xf32>
    %c0_13 = arith.constant 0 : index
    %c0_14 = arith.constant 0 : index
    %15 = vector.load %arg6[%c0_13, %c0_14] : memref<8x32xf32, #tpu.memory_space<vmem>>, vector<8x32xf32>
    tpu.vector_store %arg6[%c0_13, %c0_14], %14 {strides = array<i32>} : memref<8x32xf32, #tpu.memory_space<vmem>>, vector<8x32xf32>,
    return
  }
  func.func @transform_0(%arg0: i32) -> (i32, i32) {
    %c0_i32 = arith.constant 0 : i32
    %c0_i32_0 = arith.constant 0 : i32
    %c0_i32_1 = arith.constant 0 : i32
    return %c0_i32, %c0_i32_0 : i32, i32
  }
  func.func @transform_1(%arg0: i32) -> (i32, i32) {
    %c0_i32 = arith.constant 0 : i32
    %c0_i32_0 = arith.constant 0 : i32
    return %arg0, %c0_i32 : i32, i32
  }
  func.func @transform_2(%arg0: i32) -> (i32, i32) {
    %c0_i32 = arith.constant 0 : i32
    %c0_i32_0 = arith.constant 0 : i32
    %c0_i32_1 = arith.constant 0 : i32
    return %c0_i32, %c0_i32_0 : i32, i32
  }
  func.func @transform_3(%arg0: i32) -> (i32, i32) {
    %c0_i32 = arith.constant 0 : i32
    %c0_i32_0 = arith.constant 0 : i32
    %c0_i32_1 = arith.constant 0 : i32
    return %c0_i32, %c0_i32_0 : i32, i32
  }
  func.func @transform_4(%arg0: i32) -> (i32, i32) {
    %c0_i32 = arith.constant 0 : i32
    %c0_i32_0 = arith.constant 0 : i32
    %c0_i32_1 = arith.constant 0 : i32
    return %c0_i32, %c0_i32_0 : i32, i32
  }
  func.func @transform_5(%arg0: i32) -> (i32, i32) {
    %c0_i32 = arith.constant 0 : i32
    %c0_i32_0 = arith.constant 0 : i32
    return %arg0, %c0_i32 : i32, i32
  }
}

</mosaic_0001>

<bundles_post_ra>
// kernel: tpu_custom_call.1
= control target key start
LH: loop header
LB: loop body
LE: loop exit
PB: predicated region body
PF: predicated region fallthrough
CT: control target
= control target key end

     0   :  { %vm23_vm0 = vcmask 64512   ;;  %v382_v3 = vmov 0.0   ;;  %vm383_vm1 = vmmov 0   ;;  %s524_s0 = inlined_call_operand.vmem [shape: f32[8,32], index: 0, kind: input, shape index: {}]   ;;  %s525_s1 = inlined_call_operand.vmem [shape: f32[8,8], index: 1, kind: input, shape index: {}]   ;;  %s526_s2 = inlined_call_operand.vmem [shape: f32[32,160], index: 2, kind: input, shape index: {}]   ;;  %s527_s3 = inlined_call_operand.vmem [shape: f32[1,160], index: 3, kind: input, shape index: {}]   ;;  %s528_s4 = inlined_call_operand.vmem [shape: f32[160,32], index: 4, kind: input, shape index: {}]   ;;  %s529_s5 = inlined_call_operand.hbm [shape: f32[8,32], index: 5, kind: output, shape index: {}]  }
   0x1   :  { %v22_v0 = vld [vmem:[%s524_s0] sm:$0xff]  ;;  %v98_v2 = vld [vmem:[%s526_s2 + $0x8] sm:$0xff]  ;;  %311 = vmatprep.subr.mxu1 %v382_v3  ;;  %313 = vmatprep.mubr.msk.f32.mxu1 %vm383_vm1, %v382_v3  ;;  %v100_v4 = vld [vmem:[%s526_s2 + $0x18] sm:$0xff] }
   0x2   :  { %v21_v1 = vld [vmem:[%s525_s1] sm:$0xff]  ;;  %v99_v6 = vld [vmem:[%s526_s2 + $0x10] sm:$0xff]  ;;  %312 = vmatpush3.msra.mxu1 %v22_v0  ;;  %v316_v7 = vpack.c.bf16 %v100_v4, %v98_v2  ;;  %v102_v9 = vld [vmem:[%s526_s2 + $0x28] sm:$0xff] }
   0x3   :  { %v97_v5 = vld [vmem:[%s526_s2] sm:$0xff]  ;;  %v104_v10 = vld [vmem:[%s526_s2 + $0x38] sm:$0xff]  ;;  %314 = vmatmul.mubr.msk.f32.vlgmr.msra.gmra.mrb[0].mxu1 %vm23_vm0, %v21_v1  ;;  %v103_v13 = vld [vmem:[%s526_s2 + $0x30] sm:$0xff] }
   0x4   :  { %v318_v8 = vpack.c.bf16 %v99_v6, %v97_v5  ;;  %v101_v11 = vld [vmem:[%s526_s2 + $0x20] sm:$0xff]  ;;  %v320_v12 = vpack.c.bf16 %v104_v10, %v102_v9 }
   0x5   :  { %10 = vsyncpa [#allocation3], 0  ;;  %317 = vmatprep.subr.bf16.mxu1 %v316_v7  ;;  %185 = vmatprep.mubr.f32.mxu1 %v382_v3  ;;  %v322_v14 = vpack.c.bf16 %v103_v13, %v101_v11  ;;  %v198_v15 = vld [vmem:[%s528_s4] sm:$0xff]  ;;  %v199_v16 = vld [vmem:[%s528_s4 + $0x8] sm:$0xff]  ;;  %v384_v18 = vmov 0.0|0.0   ;;  %vm117_vm2 = vcmask 261120   ;;  %v107_v48 = vlaneseq }
   0x6   :  { %319 = vmatpush1.bf16.msra.mxu1 %v318_v8  ;;  %v200_v17 = vld [vmem:[%s528_s4 + $0x10] sm:$0xff]  ;;  %324 = vmatprep.subr.bf16.mxu0 %v384_v18  ;;  %v325_v19 = vpack.c.bf16 %v199_v16, %v198_v15  ;;  %v201_v20 = vld [vmem:[%s528_s4 + $0x18] sm:$0xff]  ;;  %v202_v22 = vld [vmem:[%s528_s4 + $0x20] sm:$0xff] }
   0x7   :  { %321 = vmatprep.subr.bf16.mxu1 %v320_v12  ;;  %v328_v21 = vpack.c.bf16 %v201_v20, %v200_v17  ;;  %v203_v23 = vld [vmem:[%s528_s4 + $0x28] sm:$0xff]  ;;  %v204_v25 = vld [vmem:[%s528_s4 + $0x30] sm:$0xff]  ;;  %v205_v26 = vld [vmem:[%s528_s4 + $0x38] sm:$0xff]  ;;  %v108_v49 = vshrl.u32 %v107_v48, 7 }
   0x8   :  { %326 = vmatpush1.bf16.msra.mxu0 %v325_v19  ;;  %v331_v24 = vpack.c.bf16 %v203_v23, %v202_v22  ;;  %v334_v27 = vpack.c.bf16 %v205_v26, %v204_v25  ;;  %v206_v28 = vld [vmem:[%s528_s4 + $0x40] sm:$0xff]  ;;  %v207_v29 = vld [vmem:[%s528_s4 + $0x48] sm:$0xff]  ;;  %v208_v31 = vld [vmem:[%s528_s4 + $0x50] sm:$0xff] }
   0x9   :  { %327 = vmatprep.subr.bf16.mxu0 %v384_v18  ;;  %v337_v30 = vpack.c.bf16 %v207_v29, %v206_v28  ;;  %v209_v32 = vld [vmem:[%s528_s4 + $0x58] sm:$0xff]  ;;  %v210_v34 = vld [vmem:[%s528_s4 + $0x60] sm:$0xff]  ;;  %v211_v35 = vld [vmem:[%s528_s4 + $0x68] sm:$0xff]  ;;  %v109_v50 = vsub.s32 0, %v108_v49  ;;  %v113_v52 = vsub.s32 1, %v108_v49 }
   0xa   :  { %323 = vmatpush1.bf16.msra.mxu1 %v322_v14  ;;  %v340_v33 = vpack.c.bf16 %v209_v32, %v208_v31  ;;  %v343_v36 = vpack.c.bf16 %v211_v35, %v210_v34  ;;  %v212_v37 = vld [vmem:[%s528_s4 + $0x70] sm:$0xff]  ;;  %v213_v38 = vld [vmem:[%s528_s4 + $0x78] sm:$0xff]  ;;  %v214_v42 = vld [vmem:[%s528_s4 + $0x80] sm:$0xff] }
   0xb   :  { %v346_v39 = vpack.c.bf16 %v213_v38, %v212_v37  ;;  %v215_v43 = vld [vmem:[%s528_s4 + $0x88] sm:$0xff]  ;;  %v216_v45 = vld [vmem:[%s528_s4 + $0x90] sm:$0xff]  ;;  %v217_v46 = vld [vmem:[%s528_s4 + $0x98] sm:$0xff]  ;;  %s385_s4 = smov [#allocation2]  }
   0xc   :  { %329 = vmatpush1.bf16.msra.mxu0 %v328_v21  ;;  %v349_v44 = vpack.c.bf16 %v215_v43, %v214_v42  ;;  %v352_v47 = vpack.c.bf16 %v217_v46, %v216_v45  ;;  %v105_v51 = vld [vmem:[%s527_s3] sm:$0x3]  ;;  %s298_s24 = sshll.u32 %s385_s4, 4  ;;  %s299_s24 = int_to_ptr.vmem [resolvable:$true] %s298_s24 }
   0xd   :  { %330 = vmatprep.subr.bf16.mxu0 %v384_v18  ;;  %v110_v53 = vrot.slane %v105_v51, %v109_v50  ;;  %v114_v54 = vrot.slane %v105_v51, %v113_v52  ;;  %s358_s3 = scalar_lea.vmem %s299_s24, 128  ;;  %p363_p1 = scmp.lt.s32.totalorder %s299_s24, %s299_s24 }
   0xe   :  { %p359_p0 = scmp.ne.s32.totalorder %s299_s24, %s358_s3  ;;  %p364_p2 = scmp.lt.s32.totalorder %s358_s3, %s358_s3 }
  0x10   :  { %332 = vmatpush1.bf16.msra.mxu0 %v331_v24  ;;  %p365_p3 = por %p364_p2, %p363_p1 }
  0x11   :  { %333 = vmatprep.subr.bf16.mxu0 %v384_v18 }
  0x12   :  { %p366_p4 = pnand %p365_p3, %p359_p0 }
  0x14   :  { %335 = vmatpush1.bf16.msra.mxu0 %v334_v27 }
  0x15   :  { %336 = vmatprep.subr.bf16.mxu0 %v384_v18 }
  0x18   :  { %338 = vmatpush1.bf16.msra.mxu0 %v337_v30 }
  0x19   :  { %339 = vmatprep.subr.bf16.mxu0 %v384_v18 }
  0x1c   :  { %341 = vmatpush1.bf16.msra.mxu0 %v340_v33 }
  0x1d   :  { %342 = vmatprep.subr.bf16.mxu0 %v384_v18 }
  0x20   :  { %344 = vmatpush1.bf16.msra.mxu0 %v343_v36 }
  0x21   :  { %345 = vmatprep.subr.bf16.mxu0 %v384_v18 }
  0x24   :  { %347 = vmatpush1.bf16.msra.mxu0 %v346_v39 }
  0x25   :  { %348 = vmatprep.subr.bf16.mxu0 %v384_v18 }
  0x28   :  { %350 = vmatpush1.bf16.msra.mxu0 %v349_v44 }
  0x29   :  { %351 = vmatprep.subr.bf16.mxu0 %v384_v18 }
  0x2c   :  { %353 = vmatpush1.bf16.msra.mxu0 %v352_v47 }
  0xd6   :  { %v93_v40 = vpop.f32.mrb[0].mxu1 }
  0xd7   :  { %v315_v41 = vpop.f32.mrb[1].mxu1  ;;  %307 = vmatmul.mubr.msk.f32.vlgmr.msra.gmra.mrb[2].mxu1 %vm117_vm2, %v93_v40 }
 0x1aa   :  { %v187_v55 = vpop.f32.mrb[2].mxu1 }
 0x1ab   :  { %v188_v56 = vadd.f32 %v187_v55, %v110_v53  ;;  %v189_v57 = vpop.f32.mrb[3].mxu1 }
 0x1ac   :  { %v190_v58 = vadd.f32 %v189_v57, %v114_v54 }
 0x1ad   :  { %v194_v59 = vmul.f32 0.01, %v188_v56  ;;  %vm192_vm4 = vcmp.ge.f32.partialorder %v188_v56, 0.0 }
 0x1ae   :  { %vm193_vm3 = vcmp.ge.f32.partialorder %v190_v58, 0.0  ;;  %v195_v60 = vmul.f32 0.01, %v190_v58 }
 0x1af   :  { %v196_v62 = vsel %vm192_vm4, %v188_v56, %v194_v59 }
 0x1b0   :  { %v197_v61 = vsel %vm193_vm3, %v190_v58, %v195_v60 }
 0x1b1   :  { %308 = vmatprep.mubr.msk.f32.mxu0 %vm117_vm2, %v197_v61 }
 0x1b2   :  { %286 = vmatmul.mubr.f32.vlgmr.msra.gmra.mrb[0].mxu0 %v196_v62 }
 0x285   :  { %v287_v63 = vpop.f32.mrb[0].mxu0 }
 0x286   :  { %291 = vst.msk [vmem:[#allocation2] sm:$0xff] %vm117_vm2, %v287_v63  ;;  %v289_v0 = vpop.f32.mrb[1].mxu0 }
 0x287   :  { %369 = shalt.err (!%p366_p4)
}
 0x288   :  { %s370_s27 = scalar_lea.hbm %s529_s5, 128 }
 0x289   :  { %p371_p5 = scmp.ne.s32.totalorder %s529_s5, %s370_s27  ;;  %p374_p6 = scmp.lt.u32.totalorder %s370_s27, %s529_s5 }
 0x28b   :  { %p376_p7 = pnand %p374_p6, %p371_p5 }
 0x28d   :  { %379 = shalt.err (!%p376_p7)
}
 0x28e   :  { %301 = dma.vmem_to_hbm [thread:$0]  %s299_s24, 128, %s529_s5, [#allocation3]  }
 0x28f   :  { %380 = dma.done.wait [#allocation3], 128  }
 0x290   :  { %381 = vsyncadd [#allocation3], 4294967168 }
 0x291   :  { %305 = vsyncpa [#allocation3], 1 }

</bundles_post_ra>
